<compile_context>
chip_gen: v6e
topology: v6e:2x2x1
jax: 0.10.0
libtpu: 0.0.40
codegen_flags: <defaults>
</compile_context>

<pallas_src>
import jax
import jax.numpy as jnp
from jax.experimental import pallas as pl
from jax.experimental.pallas import tpu as pltpu


def _round_up(x, m):
    return (x + m - 1) // m * m


def _cdiv(a, b):
    return -(-a // b)


def _build_kernel(n_points, needs_mask):
    """Kernel factory; n_points / needs_mask are static (closed over)."""

    def kernel(x_ref,
               w1_ref, t1_ref, w2_ref, t2_ref, w3_ref, t3_ref,
               w4_ref, b4_ref,
               gf_ref, pf_ref):
        ni = pl.program_id(1)
        n_tiles = pl.num_programs(1)
        bt, nt, d_in = x_ref.shape
        rows = bt * nt

        # Flatten (Bt, Nt, D) -> (Bt*Nt, D); Nt is a multiple of 8 and D stays
        # the lane axis, so this is a cheap leading-dim merge.
        x = x_ref[...].reshape(rows, d_in)

        # Per-point MLP.  BN already folded into W/t, Dropout = identity.
        # bf16 operands -> MXU, f32 accumulation, f32 epilogue (v5e-safe).
        h = jnp.dot(x, w1_ref[...], preferred_element_type=jnp.float32)
        h = jnp.maximum(h + t1_ref[...], 0.0).astype(jnp.bfloat16)
        h = jnp.dot(h, w2_ref[...], preferred_element_type=jnp.float32)
        h = jnp.maximum(h + t2_ref[...], 0.0).astype(jnp.bfloat16)
        h = jnp.dot(h, w3_ref[...], preferred_element_type=jnp.float32)
        h = jnp.maximum(h + t3_ref[...], 0.0).astype(jnp.bfloat16)
        out = jnp.dot(h, w4_ref[...], preferred_element_type=jnp.float32)
        out = out + b4_ref[...]

        c_out = out.shape[-1]
        out3 = out.reshape(bt, nt, c_out)

        # Per-point features for this (batch tile, point tile) block.
        pf_ref[...] = out3.astype(pf_ref.dtype)

        def update_gf(tile_max):
            # Running max in the resident gf output block (reduction over ni).
            @pl.when(ni == 0)
            def _():
                gf_ref[...] = tile_max

            @pl.when(ni > 0)
            def _():
                gf_ref[...] = jnp.maximum(gf_ref[...], tile_max)

        if needs_mask:
            # Only the LAST point tile can contain zero-padded points; every
            # other step takes the cheap unmasked max (no iota / select).
            is_last = ni == n_tiles - 1

            @pl.when(jnp.logical_not(is_last))
            def _():
                update_gf(jnp.max(out3, axis=1, keepdims=True))

            @pl.when(is_last)
            def _():
                row_ids = ni * nt + jax.lax.broadcasted_iota(
                    jnp.int32, (1, nt, 1), 1)
                masked = jnp.where(row_ids < n_points, out3, -jnp.inf)
                update_gf(jnp.max(masked, axis=1, keepdims=True))
        else:
            update_gf(jnp.max(out3, axis=1, keepdims=True))

    return kernel


def fold_bn_params(params):
    """Fold eval-mode BatchNorm (scale, shift) into the preceding Linear."""
    (w1, b1, s1, t1, w2, b2, s2, t2, w3, b3, s3, t3, w4, b4) = params

    def fold(w, b, s, t):
        return w * s, b * s + t

    w1f, t1f = fold(w1, b1, s1, t1)
    w2f, t2f = fold(w2, b2, s2, t2)
    w3f, t3f = fold(w3, b3, s3, t3)
    return (w1f, t1f, w2f, t2f, w3f, t3f, w4, b4)


def pointnet_encoder(x, params, *, point_tile=2048, row_target=512,
                     pf_dtype=jnp.float32):
    """x: (B, N, D_in) float32.
    Returns (global_feats (B, C_out), point_feats (B, N, C_out))."""
    B, N, D_in = x.shape

    # Fold BN into the Linears (removes per-element scale mul in the kernel).
    w1f, t1f, w2f, t2f, w3f, t3f, w4f, b4f = fold_bn_params(params)
    ws = [w1f, w2f, w3f, w4f]
    ts = [t1f, t2f, t3f, b4f]
    C_out = ws[-1].shape[1]

    # Zero-pad hidden widths to lane-dense multiples of 128 (e.g. 64 -> 128).
    # Exact: padded channels are relu(0)=0 and multiply zero rows of W_{i+1}.
    for i in range(len(ws) - 1):
        d = ws[i].shape[1]
        dp = _round_up(d, 128)
        if dp != d:
            ws[i] = jnp.pad(ws[i], ((0, 0), (0, dp - d)))
            ts[i] = jnp.pad(ts[i], ((0, 0), (0, dp - d)))
            ws[i + 1] = jnp.pad(ws[i + 1], ((0, dp - d), (0, 0)))

    # bf16 operands for the MXU; keep the epilogue shifts/bias in f32.
    ws = [w.astype(jnp.bfloat16) for w in ws]
    ts = [t.astype(jnp.float32) for t in ts]

    # Point tile (sublane aligned).  When N is small, fold several clouds per
    # step so each MXU pass still sees >= row_target rows.  Bt is a LEADING
    # block dim everywhere (gf is 3-D), so it needs no rounding to 8.
    Nt = min(point_tile, _round_up(N, 8))
    Bt = max(1, min(B, _cdiv(row_target, Nt)))
    # Keep >= 2 tiles on the parallel (batch) axis when possible so both v7x
    # TensorCores get work (no-op on single-TC v5e/v6e).
    if B >= 2 and Bt > _cdiv(B, 2):
        Bt = _cdiv(B, 2)
    N_pad = _round_up(N, Nt)
    B_pad = _round_up(B, Bt)

    xp = x.astype(jnp.bfloat16)
    if (B_pad, N_pad) != (B, N):
        xp = jnp.pad(xp, ((0, B_pad - B), (0, N_pad - N), (0, 0)))

    grid = (B_pad // Bt, N_pad // Nt)
    kernel = _build_kernel(n_points=N, needs_mask=(N_pad != N))

    flat_params = [ws[0], ts[0], ws[1], ts[1], ws[2], ts[2], ws[3], ts[3]]

    # Advisory cost estimate so XLA schedules the surrounding cast/pad/slice
    # sensibly around the custom call.
    flops = 2 * B_pad * N_pad * sum(int(w.shape[0]) * int(w.shape[1])
                                    for w in ws)
    bytes_accessed = (int(xp.size) * 2
                      + sum(int(p.size) * int(p.dtype.itemsize)
                            for p in flat_params)
                      + B_pad * N_pad * C_out * int(jnp.dtype(pf_dtype).itemsize)
                      + B_pad * C_out * 4)

    grid_spec = pltpu.PrefetchScalarGridSpec(
        num_scalar_prefetch=0,
        grid=grid,
        in_specs=[pl.BlockSpec((Bt, Nt, D_in), lambda bi, ni: (bi, ni, 0))]
                 + [pl.BlockSpec(p.shape, lambda bi, ni: (0, 0))
                    for p in flat_params],
        out_specs=[
            # Global features: (B_pad, 1, C_out) so Bt is a leading dim; the
            # block is resident across the point-tile (reduction) axis ->
            # one writeback per batch tile.
            pl.BlockSpec((Bt, 1, C_out), lambda bi, ni: (bi, 0, 0)),
            # Per-point features: lane/sublane-dense (Bt, Nt, C_out) blocks.
            pl.BlockSpec((Bt, Nt, C_out), lambda bi, ni: (bi, ni, 0)),
        ],
    )

    gf, pf = pl.pallas_call(
        kernel,
        out_shape=(
            jax.ShapeDtypeStruct((B_pad, 1, C_out), jnp.float32),
            jax.ShapeDtypeStruct((B_pad, N_pad, C_out), pf_dtype),
        ),
        grid_spec=grid_spec,
        compiler_params=pltpu.CompilerParams(
            dimension_semantics=("parallel", "arbitrary"),
            # Explicit scoped-VMEM budget: safe on v5e (16 MiB default scoped
            # of 128 MiB physical), v6e (32/128) and v7x (32/64).
            vmem_limit_bytes=32 * 1024 * 1024),
        cost_estimate=pl.CostEstimate(flops=flops, transcendentals=0,
                                      bytes_accessed=bytes_accessed),
    )(xp, *flat_params)

    return gf[:B, 0], pf[:B, :N]


def init_params(key, input_dim=8, hidden_dims=(64, 128, 256), output_dim=512,
                eps=1e-5):
    """Deterministic synthetic parameters.  BN params are pre-reduced to a
    single (scale, shift) pair per hidden layer (eval-mode BatchNorm)."""
    dims = [input_dim] + list(hidden_dims) + [output_dim]
    params = []
    keys = jax.random.split(key, 6 * len(hidden_dims) + 2 * 1 + 2)
    ki = 0
    for li in range(len(dims) - 1):
        d_in, d_out = dims[li], dims[li + 1]
        w = 0.1 * jax.random.normal(keys[ki], (d_in, d_out), jnp.float32); ki += 1
        b = 0.1 * jax.random.normal(keys[ki], (1, d_out), jnp.float32); ki += 1
        params.append(w)
        params.append(b)
        if li < len(hidden_dims):  # hidden layers have BN
            gamma = 1.0 + 0.1 * jax.random.normal(keys[ki], (1, d_out), jnp.float32); ki += 1
            beta = 0.1 * jax.random.normal(keys[ki], (1, d_out), jnp.float32); ki += 1
            r_mean = 0.1 * jax.random.normal(keys[ki], (1, d_out), jnp.float32); ki += 1
            r_var = 0.5 + jnp.abs(jax.random.normal(keys[ki], (1, d_out), jnp.float32)); ki += 1
            scale = gamma / jnp.sqrt(r_var + eps)
            shift = beta - r_mean * scale
            params.append(scale)
            params.append(shift)
    return tuple(params)


def pointnet_ref(x, params):
    """Pure-JAX reference using the same bf16-operand / f32-accumulate recipe
    as the kernel (eval-mode BN fold, dropout = identity)."""
    w1f, t1f, w2f, t2f, w3f, t3f, w4f, b4f = fold_bn_params(params)
    bf = jnp.bfloat16
    B, N, D = x.shape
    h = x.reshape(-1, D).astype(bf)
    h = jnp.maximum(jnp.dot(h, w1f.astype(bf),
                            preferred_element_type=jnp.float32) + t1f, 0.0)
    h = jnp.maximum(jnp.dot(h.astype(bf), w2f.astype(bf),
                            preferred_element_type=jnp.float32) + t2f, 0.0)
    h = jnp.maximum(jnp.dot(h.astype(bf), w3f.astype(bf),
                            preferred_element_type=jnp.float32) + t3f, 0.0)
    pf = jnp.dot(h.astype(bf), w4f.astype(bf),
                 preferred_element_type=jnp.float32) + b4f
    pf = pf.reshape(B, N, -1)
    gf = jnp.max(pf, axis=1)
    return gf, pf


if __name__ == "__main__":
    key = jax.random.PRNGKey(0)
    k_x, k_p = jax.random.split(key)

    B, N, D_in = 2, 16, 8          # batch, num_points, input_dim
    x = jax.random.normal(k_x, (B, N, D_in), dtype=jnp.float32)
    params = init_params(k_p, input_dim=D_in,
                         hidden_dims=(64, 128, 256), output_dim=512)

    gf, pf = jax.block_until_ready(pointnet_encoder(x, params))

    # Cross-check against the pure-JAX reference (same precision recipe).
    gf_ref, pf_ref = pointnet_ref(x, params)
    assert gf.shape == (B, 512) and pf.shape == (B, N, 512)
    assert jnp.allclose(gf, gf_ref, atol=1e-3, rtol=1e-3)
    assert jnp.allclose(pf, pf_ref, atol=1e-3, rtol=1e-3)

    print("KERNEL_OK")
</pallas_src>

<mosaic_0001>
module attributes {stable_mosaic.version = 11 : i64} {
  func.func @kernel(%arg0: i32, %arg1: i32, %arg2: memref<1x16x8xbf16, #tpu.memory_space<vmem>>, %arg3: memref<8x128xbf16, #tpu.memory_space<vmem>>, %arg4: memref<1x128xf32, #tpu.memory_space<vmem>>, %arg5: memref<128x128xbf16, #tpu.memory_space<vmem>>, %arg6: memref<1x128xf32, #tpu.memory_space<vmem>>, %arg7: memref<128x256xbf16, #tpu.memory_space<vmem>>, %arg8: memref<1x256xf32, #tpu.memory_space<vmem>>, %arg9: memref<256x512xbf16, #tpu.memory_space<vmem>>, %arg10: memref<1x512xf32, #tpu.memory_space<vmem>>, %arg11: memref<1x1x512xf32, #tpu.memory_space<vmem>>, %arg12: memref<1x16x512xf32, #tpu.memory_space<vmem>>) attributes {dimension_semantics = [#tpu.dimension_semantics<parallel>, #tpu.dimension_semantics<arbitrary>], iteration_bounds = array<i64: 2, 1>, scalar_prefetch = 0 : i64, scratch_operands = 0 : i64, tpu.core_type = #tpu.core_type<tc>, window_params = [{transform_indices = @transform_0, window_bounds = array<i64: 1, 16, 8>}, {pipeline_mode = #tpu.pipeline_mode<synchronous>, transform_indices = @transform_1, window_bounds = array<i64: 8, 128>}, {pipeline_mode = #tpu.pipeline_mode<synchronous>, transform_indices = @transform_2, window_bounds = array<i64: 1, 128>}, {pipeline_mode = #tpu.pipeline_mode<synchronous>, transform_indices = @transform_3, window_bounds = array<i64: 128, 128>}, {pipeline_mode = #tpu.pipeline_mode<synchronous>, transform_indices = @transform_4, window_bounds = array<i64: 1, 128>}, {pipeline_mode = #tpu.pipeline_mode<synchronous>, transform_indices = @transform_5, window_bounds = array<i64: 128, 256>}, {pipeline_mode = #tpu.pipeline_mode<synchronous>, transform_indices = @transform_6, window_bounds = array<i64: 1, 256>}, {pipeline_mode = #tpu.pipeline_mode<synchronous>, transform_indices = @transform_7, window_bounds = array<i64: 256, 512>}, {pipeline_mode = #tpu.pipeline_mode<synchronous>, transform_indices = @transform_8, window_bounds = array<i64: 1, 512>}, {transform_indices = @transform_9, window_bounds = array<i64: 1, 1, 512>}, {transform_indices = @transform_10, window_bounds = array<i64: 1, 16, 512>}]} {
    %c0 = arith.constant 0 : index
    %c0_0 = arith.constant 0 : index
    %c0_1 = arith.constant 0 : index
    %0 = vector.load %arg2[%c0, %c0_0, %c0_1] : memref<1x16x8xbf16, #tpu.memory_space<vmem>>, vector<1x16x8xbf16>
    %1 = vector.shape_cast %0 : vector<1x16x8xbf16> to vector<16x8xbf16>
    %c0_2 = arith.constant 0 : index
    %c0_3 = arith.constant 0 : index
    %2 = vector.load %arg3[%c0_2, %c0_3] : memref<8x128xbf16, #tpu.memory_space<vmem>>, vector<8x128xbf16>
    %cst = arith.constant dense<0.000000e+00> : vector<16x128xf32>
    %3 = tpu.matmul %1, %2, %cst {dimension_numbers = #tpu.dot_dimension_numbers<[1], [0], [0], [1], [0, 0, 1, 1], [], []>} : vector<16x8xbf16>, vector<8x128xbf16>, vector<16x128xf32> -> vector<16x128xf32>
    %c0_4 = arith.constant 0 : index
    %c0_5 = arith.constant 0 : index
    %4 = vector.load %arg4[%c0_4, %c0_5] : memref<1x128xf32, #tpu.memory_space<vmem>>, vector<1x128xf32>
    %5 = vector.broadcast %4 : vector<1x128xf32> to vector<16x128xf32>
    %6 = arith.addf %3, %5 : vector<16x128xf32>
    %cst_6 = arith.constant 0.000000e+00 : f32
    %7 = vector.broadcast %cst_6 : f32 to vector<16x128xf32>
    %8 = arith.maximumf %6, %7 : vector<16x128xf32>
    %9 = arith.truncf %8 : vector<16x128xf32> to vector<16x128xbf16>
    %c0_7 = arith.constant 0 : index
    %c0_8 = arith.constant 0 : index
    %10 = vector.load %arg5[%c0_7, %c0_8] : memref<128x128xbf16, #tpu.memory_space<vmem>>, vector<128x128xbf16>
    %cst_9 = arith.constant dense<0.000000e+00> : vector<16x128xf32>
    %11 = tpu.matmul %9, %10, %cst_9 {dimension_numbers = #tpu.dot_dimension_numbers<[1], [0], [0], [1], [0, 0, 1, 1], [], []>} : vector<16x128xbf16>, vector<128x128xbf16>, vector<16x128xf32> -> vector<16x128xf32>
    %c0_10 = arith.constant 0 : index
    %c0_11 = arith.constant 0 : index
    %12 = vector.load %arg6[%c0_10, %c0_11] : memref<1x128xf32, #tpu.memory_space<vmem>>, vector<1x128xf32>
    %13 = vector.broadcast %12 : vector<1x128xf32> to vector<16x128xf32>
    %14 = arith.addf %11, %13 : vector<16x128xf32>
    %cst_12 = arith.constant 0.000000e+00 : f32
    %15 = vector.broadcast %cst_12 : f32 to vector<16x128xf32>
    %16 = arith.maximumf %14, %15 : vector<16x128xf32>
    %17 = arith.truncf %16 : vector<16x128xf32> to vector<16x128xbf16>
    %c0_13 = arith.constant 0 : index
    %c0_14 = arith.constant 0 : index
    %18 = vector.load %arg7[%c0_13, %c0_14] : memref<128x256xbf16, #tpu.memory_space<vmem>>, vector<128x256xbf16>
    %cst_15 = arith.constant dense<0.000000e+00> : vector<16x256xf32>
    %19 = tpu.matmul %17, %18, %cst_15 {dimension_numbers = #tpu.dot_dimension_numbers<[1], [0], [0], [1], [0, 0, 1, 1], [], []>} : vector<16x128xbf16>, vector<128x256xbf16>, vector<16x256xf32> -> vector<16x256xf32>
    %c0_16 = arith.constant 0 : index
    %c0_17 = arith.constant 0 : index
    %20 = vector.load %arg8[%c0_16, %c0_17] : memref<1x256xf32, #tpu.memory_space<vmem>>, vector<1x256xf32>
    %21 = vector.broadcast %20 : vector<1x256xf32> to vector<16x256xf32>
    %22 = arith.addf %19, %21 : vector<16x256xf32>
    %cst_18 = arith.constant 0.000000e+00 : f32
    %23 = vector.broadcast %cst_18 : f32 to vector<16x256xf32>
    %24 = arith.maximumf %22, %23 : vector<16x256xf32>
    %25 = arith.truncf %24 : vector<16x256xf32> to vector<16x256xbf16>
    %c0_19 = arith.constant 0 : index
    %c0_20 = arith.constant 0 : index
    %26 = vector.load %arg9[%c0_19, %c0_20] : memref<256x512xbf16, #tpu.memory_space<vmem>>, vector<256x512xbf16>
    %cst_21 = arith.constant dense<0.000000e+00> : vector<16x512xf32>
    %27 = tpu.matmul %25, %26, %cst_21 {dimension_numbers = #tpu.dot_dimension_numbers<[1], [0], [0], [1], [0, 0, 1, 1], [], []>} : vector<16x256xbf16>, vector<256x512xbf16>, vector<16x512xf32> -> vector<16x512xf32>
    %c0_22 = arith.constant 0 : index
    %c0_23 = arith.constant 0 : index
    %28 = vector.load %arg10[%c0_22, %c0_23] : memref<1x512xf32, #tpu.memory_space<vmem>>, vector<1x512xf32>
    %29 = vector.broadcast %28 : vector<1x512xf32> to vector<16x512xf32>
    %30 = arith.addf %27, %29 : vector<16x512xf32>
    %31 = vector.shape_cast %30 : vector<16x512xf32> to vector<1x16x512xf32>
    %c0_24 = arith.constant 0 : index
    %c0_25 = arith.constant 0 : index
    %c0_26 = arith.constant 0 : index
    %32 = vector.load %arg12[%c0_24, %c0_25, %c0_26] : memref<1x16x512xf32, #tpu.memory_space<vmem>>, vector<1x16x512xf32>
    tpu.vector_store %arg12[%c0_24, %c0_25, %c0_26], %31 {strides = array<i32>} : memref<1x16x512xf32, #tpu.memory_space<vmem>>, vector<1x16x512xf32>,
    %cst_27 = arith.constant dense<0xFF800000> : vector<1x512xf32>
    %33 = vector.multi_reduction <maximumf>, %31, %cst_27 [1] : vector<1x16x512xf32> to vector<1x512xf32>
    %34 = vector.shape_cast %33 : vector<1x512xf32> to vector<1x1x512xf32>
    %c0_i32 = arith.constant 0 : i32
    %35 = arith.cmpi eq, %arg1, %c0_i32 : i32
    %36 = arith.extui %35 : i1 to i32
    %c0_i32_28 = arith.constant 0 : i32
    %37 = arith.cmpi ne, %36, %c0_i32_28 : i32
    scf.if %37 {
      %c0_31 = arith.constant 0 : index
      %c0_32 = arith.constant 0 : index
      %c0_33 = arith.constant 0 : index
      %41 = vector.load %arg11[%c0_31, %c0_32, %c0_33] : memref<1x1x512xf32, #tpu.memory_space<vmem>>, vector<1x1x512xf32>
      tpu.vector_store %arg11[%c0_31, %c0_32, %c0_33], %34 {strides = array<i32>} : memref<1x1x512xf32, #tpu.memory_space<vmem>>, vector<1x1x512xf32>,
    } else {
    }
    %c0_i32_29 = arith.constant 0 : i32
    %38 = arith.cmpi sgt, %arg1, %c0_i32_29 : i32
    %39 = arith.extui %38 : i1 to i32
    %c0_i32_30 = arith.constant 0 : i32
    %40 = arith.cmpi ne, %39, %c0_i32_30 : i32
    scf.if %40 {
      %c0_31 = arith.constant 0 : index
      %c0_32 = arith.constant 0 : index
      %c0_33 = arith.constant 0 : index
      %41 = vector.load %arg11[%c0_31, %c0_32, %c0_33] : memref<1x1x512xf32, #tpu.memory_space<vmem>>, vector<1x1x512xf32>
      %42 = arith.maximumf %41, %34 : vector<1x1x512xf32>
      %c0_34 = arith.constant 0 : index
      %c0_35 = arith.constant 0 : index
      %c0_36 = arith.constant 0 : index
      %43 = vector.load %arg11[%c0_34, %c0_35, %c0_36] : memref<1x1x512xf32, #tpu.memory_space<vmem>>, vector<1x1x512xf32>
      tpu.vector_store %arg11[%c0_34, %c0_35, %c0_36], %42 {strides = array<i32>} : memref<1x1x512xf32, #tpu.memory_space<vmem>>, vector<1x1x512xf32>,
    } else {
    }
    return
  }
  func.func @transform_0(%arg0: i32, %arg1: i32) -> (i32, i32, i32) {
    %c0_i32 = arith.constant 0 : i32
    %c0_i32_0 = arith.constant 0 : i32
    return %arg0, %arg1, %c0_i32 : i32, i32, i32
  }
  func.func @transform_1(%arg0: i32, %arg1: i32) -> (i32, i32) {
    %c0_i32 = arith.constant 0 : i32
    %c0_i32_0 = arith.constant 0 : i32
    %c0_i32_1 = arith.constant 0 : i32
    return %c0_i32, %c0_i32_0 : i32, i32
  }
  func.func @transform_2(%arg0: i32, %arg1: i32) -> (i32, i32) {
    %c0_i32 = arith.constant 0 : i32
    %c0_i32_0 = arith.constant 0 : i32
    %c0_i32_1 = arith.constant 0 : i32
    return %c0_i32, %c0_i32_0 : i32, i32
  }
  func.func @transform_3(%arg0: i32, %arg1: i32) -> (i32, i32) {
    %c0_i32 = arith.constant 0 : i32
    %c0_i32_0 = arith.constant 0 : i32
    %c0_i32_1 = arith.constant 0 : i32
    return %c0_i32, %c0_i32_0 : i32, i32
  }
  func.func @transform_4(%arg0: i32, %arg1: i32) -> (i32, i32) {
    %c0_i32 = arith.constant 0 : i32
    %c0_i32_0 = arith.constant 0 : i32
    %c0_i32_1 = arith.constant 0 : i32
    return %c0_i32, %c0_i32_0 : i32, i32
  }
  func.func @transform_5(%arg0: i32, %arg1: i32) -> (i32, i32) {
    %c0_i32 = arith.constant 0 : i32
    %c0_i32_0 = arith.constant 0 : i32
    %c0_i32_1 = arith.constant 0 : i32
    return %c0_i32, %c0_i32_0 : i32, i32
  }
  func.func @transform_6(%arg0: i32, %arg1: i32) -> (i32, i32) {
    %c0_i32 = arith.constant 0 : i32
    %c0_i32_0 = arith.constant 0 : i32
    %c0_i32_1 = arith.constant 0 : i32
    return %c0_i32, %c0_i32_0 : i32, i32
  }
  func.func @transform_7(%arg0: i32, %arg1: i32) -> (i32, i32) {
    %c0_i32 = arith.constant 0 : i32
    %c0_i32_0 = arith.constant 0 : i32
    %c0_i32_1 = arith.constant 0 : i32
    return %c0_i32, %c0_i32_0 : i32, i32
  }
  func.func @transform_8(%arg0: i32, %arg1: i32) -> (i32, i32) {
    %c0_i32 = arith.constant 0 : i32
    %c0_i32_0 = arith.constant 0 : i32
    %c0_i32_1 = arith.constant 0 : i32
    return %c0_i32, %c0_i32_0 : i32, i32
  }
  func.func @transform_9(%arg0: i32, %arg1: i32) -> (i32, i32, i32) {
    %c0_i32 = arith.constant 0 : i32
    %c0_i32_0 = arith.constant 0 : i32
    %c0_i32_1 = arith.constant 0 : i32
    return %arg0, %c0_i32, %c0_i32_0 : i32, i32, i32
  }
  func.func @transform_10(%arg0: i32, %arg1: i32) -> (i32, i32, i32) {
    %c0_i32 = arith.constant 0 : i32
    %c0_i32_0 = arith.constant 0 : i32
    return %arg0, %arg1, %c0_i32 : i32, i32, i32
  }
}

</mosaic_0001>

<bundles_post_ra>
// kernel: tpu_custom_call.1
= control target key start
LH: loop header
LB: loop body
LE: loop exit
PB: predicated region body
PF: predicated region fallthrough
CT: control target
= control target key end

     0   :  { %16 = vsyncpa [#allocation3], 0  ;;  %s2432_s0 = inlined_call_operand.vmem [shape: bf16[2,16,8], index: 0, kind: input, shape index: {}]   ;;  %s2433_s1 = inlined_call_operand.vmem [shape: bf16[8,128], index: 1, kind: input, shape index: {}]   ;;  %s2434_s2 = inlined_call_operand.vmem [shape: f32[1,128], index: 2, kind: input, shape index: {}]   ;;  %s2435_s3 = inlined_call_operand.hbm [shape: bf16[128,128], index: 3, kind: input, shape index: {}]   ;;  %s2436_s4 = inlined_call_operand.vmem [shape: f32[1,128], index: 4, kind: input, shape index: {}]   ;;  %s2437_s5 = inlined_call_operand.hbm [shape: bf16[128,256], index: 5, kind: input, shape index: {}]   ;;  %s2438_s6 = inlined_call_operand.vmem [shape: f32[1,256], index: 6, kind: input, shape index: {}]   ;;  %s2439_s7 = inlined_call_operand.hbm [shape: bf16[256,512], index: 7, kind: input, shape index: {}]   ;;  %s2440_s8 = inlined_call_operand.vmem [shape: f32[1,512], index: 8, kind: input, shape index: {}]   ;;  %s2441_s9 = inlined_call_operand.hbm [shape: f32[2,1,512], index: 9, kind: output, shape index: {0}]   ;;  %s2442_s10 = inlined_call_operand.hbm [shape: f32[2,16,512], index: 10, kind: output, shape index: {1}]  }
   0x1   :  { %17 = vsyncpa [#allocation6], 0 }
   0x2   :  { %18 = vsyncpa [#allocation4], 0 }
   0x3   :  { %20 = vsyncpa [#allocation4 + $0x1], 0 }
   0x4   :  { %21 = vsyncpa [#allocation10], 0 }
   0x5   :  { %23 = vsyncpa [#allocation10 + $0x1], 0  ;;  %s2221_s13 = smov 0   ;;  %s2223_s14 = smov 0  }
   0x6   :  { %s2225_s15 = smov 0   ;;  %s2227_s16 = smov 0  }
   0x7   :  { %s2229_s17 = smov 0   ;;  %s2231_s18 = smov 0  }
   0x8 LB: > { %2445 = sst [smem:[#allocation15_spill]] %s2143_s17  ;;  %s1568_s19 = sadd.s32 4294967295, %s2147_s18   ;;  %s2147_s18 = sphi %s2231_s18, %s29_s18   ;;  %s2143_s17 = sphi %s2229_s17, %s2456_s17   ;;  %s2139_s16 = sphi %s2227_s16, %s2455_s16   ;;  %s2135_s15 = sphi %s2225_s15, %s2459_s15   ;;  %s2131_s14 = sphi %s2223_s14, %s2458_s14   ;;  %s2127_s13 = sphi %s2221_s13, %s2457_s13  }
   0x9   : > { %s1569_s20 = sadd.s32 4294967294, %s2147_s18   ;;  %s41_s21 = sadd.s32 1, %s2143_s17 }
   0xa   : > { %s244_s22 = sadd.s32 1, %s2135_s15  ;;  %p43_p0 = scmp.ge.s32.totalorder %s41_s21, 2 }
   0xb   : > { %p254_p1 = scmp.ne.s32.totalorder %s2135_s15, %s2131_s14  ;;  %p255_p2 = scmp.eq.s32.totalorder %s1568_s19, 1 }
   0xc   : > { %p260_p3 = scmp.ne.s32.totalorder %s2131_s14, %s2127_s13  ;;  %s2461_s21 = smov (%p43_p0, %s41_s21), 0 }
   0xd   : > { %2446 = sst [smem:[#allocation16_spill]] %s2461_s21  ;;  %p2261_p4 = por %p255_p2, %p254_p1 }
   0xe   : > { %p261_p5 = scmp.eq.s32.totalorder %s1569_s20, 1  ;;  %s241_s24 = ssub.s32 %s2143_s17, %s2461_s21 }
   0xf   : > { %p1570_p6 = scmp.ge.s32.totalorder %s2147_s18, 1  ;;  %p242_p7 = scmp.eq.s32.totalorder %s241_s24, 0 }
  0x10   : > { %p2268_p8 = por %p261_p5, %p260_p3  ;;  %p296_p9 = scmp.lt.s32.totalorder %s2147_s18, 3 }
  0x11   : > { %s2274_s26 = scalar_select %p242_p7, %s2135_s15, %s244_s22  }
  0x12   : > { %s2448_s25 = scalar_select %p2268_p8, 1, 0 }
  0x13   : > { %2449 = sst [smem:[#allocation17_spill]] %s2274_s26  ;;  %p2276_p10 = pnand %p1570_p6, %p296_p9 }
  0x14   : > { %p2280_p11 = scmp.eq.s32.totalorder %s1568_s19, 0  ;;  %s2149_s29 = smov [#allocation5]  }
  0x15   : > { %p1739_p12 = pneg %p2276_p10  ;;  %s330_s30 = sshll.u32 %s2149_s29, 4  ;;  %s331_s30 = int_to_ptr.vmem [resolvable:$true] %s330_s30 }
  0x16   : > { %s2150_s12 = smov [#allocation2]   ;;  %s1966_s19 = scalar_lea.vmem %s331_s30, 2048 }
  0x17   : > { %p2288_p13 = pnand %p2280_p11, %p1739_p12  ;;  %s314_s20 = sshll.u32 %s2150_s12, 4  ;;  %s315_s20 = int_to_ptr.vmem [resolvable:$true] %s314_s20 }
  0x18   : > { %p1967_p1 = scmp.ne.s32.totalorder %s331_s30, %s1966_s19  ;;  %p1974_p5 = scmp.lt.s32.totalorder %s331_s30, %s331_s30 }
  0x19   : > { %p1957_p0 = pneg %p2288_p13  ;;  %p1975_p6 = scmp.lt.s32.totalorder %s1966_s19, %s1966_s19 }
  0x1b   : > { %p1969_p2 = pnand %p1967_p1, %p1957_p0  ;;  %p1976_p7 = por %p1975_p6, %p1974_p5 }
  0x1d   : > { %p1970_p3 = pneg %p1969_p2 }
  0x1f   : > { %p1977_p9 = pnand %p1976_p7, %p1970_p3 }
  0x21   : > { %1980 = shalt.err (!%p1977_p9)
}
  0x22   : > { %s2151_s22 = smov 128   ;;  %s2152_s24 = smov 8  }
  0x23   : > { %1745 = dma.hbm_to_vmem [thread:$0]  (!%p2288_p13), %s2437_s5, 2048, %s331_s30, [#allocation6], %s2151_s22, %s2151_s22, %s2152_s24  }
  0x24   : > { %s1992_s21 = scalar_lea.vmem %s315_s20, 1024  ;;  %p2000_p8 = scmp.lt.s32.totalorder %s315_s20, %s315_s20 }
  0x25   : > { %p1993_p12 = scmp.ne.s32.totalorder %s315_s20, %s1992_s21  ;;  %p2001_p5 = scmp.lt.s32.totalorder %s1992_s21, %s1992_s21 }
  0x27   : > { %p1995_p1 = pnand %p1993_p12, %p1957_p0  ;;  %p2002_p3 = por %p2001_p5, %p2000_p8 }
  0x29   : > { %p1996_p2 = pneg %p1995_p1 }
  0x2b   : > { %p2003_p6 = pnand %p2002_p3, %p1996_p2 }
  0x2d   : > { %2006 = shalt.err (!%p2003_p6)
}
  0x2e   : > { %s2153_s19 = smov 64   ;;  %s2154_s17 = smov 4  }
  0x2f   : > { %1742 = dma.hbm_to_vmem [thread:$0]  (!%p2288_p13), %s2435_s3, 1024, %s315_s20, [#allocation3], %s2153_s19, %s2153_s19, %s2154_s17  }
  0x30   : > { %s2155_s30 = smov [#allocation7]  }
  0x31   : > { %s346_s22 = sshll.u32 %s2155_s30, 4  ;;  %s347_s22 = int_to_ptr.vmem [resolvable:$true] %s346_s22 }
  0x32   : > { %s2018_s24 = scalar_lea.vmem %s347_s22, 8192  ;;  %p2026_p12 = scmp.lt.s32.totalorder %s347_s22, %s347_s22 }
  0x33   : > { %p2019_p7 = scmp.ne.s32.totalorder %s347_s22, %s2018_s24  ;;  %p2027_p1 = scmp.lt.s32.totalorder %s2018_s24, %s2018_s24 }
  0x35   : > { %p2021_p9 = pnand %p2019_p7, %p1957_p0  ;;  %p2028_p2 = por %p2027_p1, %p2026_p12 }
  0x37   : > { %p2022_p8 = pneg %p2021_p9 }
  0x39   : > { %p2029_p5 = pnand %p2028_p2, %p2022_p8 }
  0x3b   : > { %2032 = shalt.err (!%p2029_p5)
}
  0x3c   : > { %s2156_s21 = smov 256   ;;  %s2157_s12 = smov 16  }
  0x3d   : > { %1748 = dma.hbm_to_vmem [thread:$0]  (!%p2288_p13), %s2439_s7, 8192, %s347_s22, [#allocation6], %s2156_s21, %s2156_s21, %s2157_s12  }
  0x3e   : > { %378 = sbr.rel (%p2276_p10) target bundleno = 937 (0x3a9), region = 56 }
  0x43   : > { %2110 = dma.done.wait (%p2280_p11), [#allocation3], 1024  }
  0x44   : > { %2112 = vsyncadd (%p2280_p11), [#allocation3], 4294966272 }
  0x45   : > { %2114 = dma.done.wait (%p2280_p11), [#allocation6], 10240  }
  0x46   : > { %2116 = vsyncadd (%p2280_p11), [#allocation6], 4294957056  ;;  %p434_p0 = scmp.lt.s32.totalorder %s2139_s16, 1  ;;  %v2158_v0 = vmov 0.0   ;;  %vm2159_vm0 = vmmov 0   ;;  %vm464_vm1 = vcmask 1043456  }
  0x47   : > { %1697 = vmatprep.subr.bf16.mxu0 %v2158_v0  ;;  %1699 = vmatprep.mubr.msk.bf16.mxu0 %vm2159_vm0, %v2158_v0  ;;  %v447_v1 = vld [vmem:[%s2433_s1] sm:$0xf]  ;;  %vm460_vm2 = vcmask 64512   ;;  %v1827_v4 = vld [vmem:[#allocation2 + $0x38] sm:$0xff]   ;;  %v1828_v5 = vld [vmem:[#allocation2 + $0x30] sm:$0xff]   ;;  %v2160_v38 = vmov 0  }
  0x48   : > { %s435_s27 = scalar_select %p434_p0, %s2139_s16, 1  ;;  %1703 = vmatprep.subr.bf16.mxu1 %v2158_v0  ;;  %1719 = vmatprep.mubr.msk.bf16.mxu1 %vm2159_vm0, %v2158_v0  ;;  %v466_v2 = vsel %vm464_vm1, %v447_v1, 0  ;;  %v1829_v6 = vld [vmem:[#allocation2 + $0x28] sm:$0xff]   ;;  %v1830_v7 = vld [vmem:[#allocation2 + $0x20] sm:$0xff]   ;;  %v1831_v8 = vld [vmem:[#allocation2 + $0x18] sm:$0xff]  }
  0x49   : > { %1698 = vmatpush3.bf16.msra.mxu0 %v466_v2  ;;  %1704 = vmatpush3.bf16.msra.mxu1 %v1827_v4  ;;  %v1832_v9 = vld [vmem:[#allocation2 + $0x10] sm:$0xff]   ;;  %v1833_v10 = vld [vmem:[#allocation2 + $0x8] sm:$0xff]   ;;  %v1834_v11 = vld [vmem:[#allocation2] sm:$0xff]   ;;  %s1685_s22 = sshll.u32 %s2139_s16, 10  ;;  %s2161_s17 = smov [#allocation9]  }
  0x4a   : > { %s1683_s11 = sshll.u32 %s435_s27, 3  ;;  %1705 = vmatprep.subr.bf16.mxu1 %v2158_v0  ;;  %v1835_v12 = vld [vmem:[#allocation5 + $0x70] ss:$8 sps:$4 sm:$0xff]   ;;  %v1837_v13 = vld [vmem:[#allocation5 + $0x74] ss:$8 sps:$4 sm:$0xff]   ;;  %s2352_s27 = sand.u32 1, %s2131_s14  }
  0x4b   : > { %s441_s29 = scalar_lea.vmem %s2432_s0, %s1683_s11  ;;  %v1840_v14 = vld [vmem:[#allocation5 + $0x64] ss:$8 sps:$4 sm:$0xff]   ;;  %735 = vmatprep.subr.bf16.mxu0 %v1837_v13  ;;  %v1838_v15 = vld [vmem:[#allocation5 + $0x60] ss:$8 sps:$4 sm:$0xff]   ;;  %v1843_v16 = vld [vmem:[#allocation5 + $0x54] ss:$8 sps:$4 sm:$0xff]   ;;  %s2365_s21 = scalar_lea.hbm %s2442_s10, %s1685_s22 }
  0x4c   : > { %v1826_v3 = vld [vmem:[%s441_s29] sm:$0xff]   ;;  %v1841_v17 = vld [vmem:[#allocation5 + $0x50] ss:$8 sps:$4 sm:$0xff]   ;;  %v1849_v20 = vld [vmem:[#allocation5 + $0x34] ss:$8 sps:$4 sm:$0xff]   ;;  %s1580_s19 = sshll.u32 %s2352_s27, 6 }
  0x4d   : > { %1700 = vmatmul.mubr.msk.bf16.vlgmr.msra.gmra.mxu0 %vm460_vm2, %v1826_v3  ;;  %1706 = vmatpush3.bf16.msra.mxu1 %v1828_v5  ;;  %v1846_v18 = vld [vmem:[#allocation5 + $0x44] ss:$8 sps:$4 sm:$0xff]   ;;  %v1844_v19 = vld [vmem:[#allocation5 + $0x40] ss:$8 sps:$4 sm:$0xff]   ;;  %v1847_v21 = vld [vmem:[#allocation5 + $0x30] ss:$8 sps:$4 sm:$0xff]  }
  0x4e   : > { %1707 = vmatprep.subr.bf16.mxu1 %v2158_v0  ;;  %736 = vmatpush1.bf16.msra.mxu0 %v1835_v12  ;;  %v1852_v22 = vld [vmem:[#allocation5 + $0x24] ss:$8 sps:$4 sm:$0xff]   ;;  %v1850_v23 = vld [vmem:[#allocation5 + $0x20] ss:$8 sps:$4 sm:$0xff]   ;;  %v1855_v34 = vld [vmem:[#allocation5 + $0x14] ss:$8 sps:$4 sm:$0xff]  }
  0x4f   : > { %737 = vmatprep.subr.bf16.mxu0 %v1840_v14  ;;  %v1583_v24 = vld [vmem:[%s2434_s2] ss:$0 sm:$0xff]  ;;  %v1853_v35 = vld [vmem:[#allocation5 + $0x10] ss:$8 sps:$4 sm:$0xff]   ;;  %v1858_v36 = vld [vmem:[#allocation5 + $0x4] ss:$8 sps:$4 sm:$0xff]   ;;  %767 = vmatprep.mubr.bf16.mxu0 %v2160_v38 }
  0x50   : > { %v1856_v37 = vld [vmem:[#allocation5] ss:$8 sps:$4 sm:$0xff]   ;;  %v1861_v40 = vld [vmem:[#allocation7 + $0xe4] ss:$16 sps:$4 sm:$0xff]   ;;  %v1864_v41 = vld [vmem:[#allocation7 + $0xec] ss:$16 sps:$4 sm:$0xff]  }
  0x51   : > { %1708 = vmatpush3.bf16.msra.mxu1 %v1829_v6  ;;  %v1859_v39 = vld [vmem:[#allocation7 + $0xe0] ss:$16 sps:$4 sm:$0xff]   ;;  %v1867_v42 = vld [vmem:[#allocation7 + $0xc4] ss:$16 sps:$4 sm:$0xff]   ;;  %v1870_v13 = vld [vmem:[#allocation7 + $0xcc] ss:$16 sps:$4 sm:$0xff]  }
  0x52   : > { %1709 = vmatprep.subr.bf16.mxu1 %v2158_v0  ;;  %738 = vmatpush1.bf16.msra.mxu0 %v1838_v15  ;;  %v1865_v43 = vld [vmem:[#allocation7 + $0xc0] ss:$16 sps:$4 sm:$0xff]   ;;  %v1873_v44 = vld [vmem:[#allocation7 + $0xa4] ss:$16 sps:$4 sm:$0xff]   ;;  %v1868_v14 = vld [vmem:[#allocation7 + $0xc8] ss:$16 sps:$4 sm:$0xff]  }
  0x53   : > { %739 = vmatprep.subr.bf16.mxu0 %v1843_v16  ;;  %v1871_v45 = vld [vmem:[#allocation7 + $0xa0] ss:$16 sps:$4 sm:$0xff]   ;;  %v1879_v46 = vld [vmem:[#allocation7 + $0x84] ss:$16 sps:$4 sm:$0xff]   ;;  %v1876_v15 = vld [vmem:[#allocation7 + $0xac] ss:$16 sps:$4 sm:$0xff]  }
  0x54   : > { %v1877_v47 = vld [vmem:[#allocation7 + $0x80] ss:$16 sps:$4 sm:$0xff]   ;;  %v1885_v48 = vld [vmem:[#allocation7 + $0x64] ss:$16 sps:$4 sm:$0xff]   ;;  %v1874_v16 = vld [vmem:[#allocation7 + $0xa8] ss:$16 sps:$4 sm:$0xff]  }
  0x55   : > { %1710 = vmatpush3.bf16.msra.mxu1 %v1830_v7  ;;  %v1883_v49 = vld [vmem:[#allocation7 + $0x60] ss:$16 sps:$4 sm:$0xff]   ;;  %v1891_v50 = vld [vmem:[#allocation7 + $0x44] ss:$16 sps:$4 sm:$0xff]   ;;  %v1942_v38 = vld [vmem:[#allocation7 + $0x14c] ss:$16 sps:$4 sm:$0xff]  }
  0x56   : > { %1711 = vmatprep.subr.bf16.mxu1 %v2158_v0  ;;  %740 = vmatpush1.bf16.msra.mxu0 %v1841_v17  ;;  %v1889_v51 = vld [vmem:[#allocation7 + $0x40] ss:$16 sps:$4 sm:$0xff]   ;;  %v1897_v52 = vld [vmem:[#allocation7 + $0x24] ss:$16 sps:$4 sm:$0xff]   ;;  %v1882_v17 = vld [vmem:[#allocation7 + $0x8c] ss:$16 sps:$4 sm:$0xff]  }
  0x57   : > { %741 = vmatprep.subr.bf16.mxu0 %v1846_v18  ;;  %v1895_v53 = vld [vmem:[#allocation7 + $0x20] ss:$16 sps:$4 sm:$0xff]   ;;  %v1903_v54 = vld [vmem:[#allocation7 + $0x4] ss:$16 sps:$4 sm:$0xff]   ;;  %v1880_v18 = vld [vmem:[#allocation7 + $0x88] ss:$16 sps:$4 sm:$0xff]  }
  0x58   : > { %v1901_v55 = vld [vmem:[#allocation7] ss:$16 sps:$4 sm:$0xff]   ;;  %v1909_v56 = vld [vmem:[#allocation7 + $0x1e4] ss:$16 sps:$4 sm:$0xff]   ;;  %s432_s29 = scalar_lea.vmem [#allocation9], %s1580_s19  ;;  %s1396_s12 = scalar_lea.sflag [#allocation10], %s2352_s27 }
  0x59   : > { %1712 = vmatpush3.bf16.msra.mxu1 %v1831_v8  ;;  %v1907_v57 = vld [vmem:[#allocation7 + $0x1e0] ss:$16 sps:$4 sm:$0xff]   ;;  %v1915_v58 = vld [vmem:[#allocation7 + $0x1c4] ss:$16 sps:$4 sm:$0xff]   ;;  %s1426_s30 = sshll.u32 %s432_s29, 4  ;;  %s2037_s11 = sshll.u32 %s2161_s17, 4  ;;  %s2360_s30 = int_to_ptr.vmem [resolvable:$true] %s1426_s30  ;;  %s2038_s11 = int_to_ptr.vmem [resolvable:$false] %s2037_s11 }
  0x5a   : > { %1713 = vmatprep.subr.bf16.mxu1 %v2158_v0  ;;  %742 = vmatpush1.bf16.msra.mxu0 %v1844_v19  ;;  %v1913_v59 = vld [vmem:[#allocation7 + $0x1c0] ss:$16 sps:$4 sm:$0xff]   ;;  %v1921_v60 = vld [vmem:[#allocation7 + $0x1a4] ss:$16 sps:$4 sm:$0xff]   ;;  %v1888_v19 = vld [vmem:[#allocation7 + $0x6c] ss:$16 sps:$4 sm:$0xff]   ;;  %p2040_p3 = scmp.lt.s32.totalorder %s2360_s30, %s2038_s11 }
  0x5b   : > { %743 = vmatprep.subr.bf16.mxu0 %v1849_v20  ;;  %v1919_v61 = vld [vmem:[#allocation7 + $0x1a0] ss:$16 sps:$4 sm:$0xff]   ;;  %v1927_v62 = vld [vmem:[#allocation7 + $0x184] ss:$16 sps:$4 sm:$0xff]   ;;  %v1886_v20 = vld [vmem:[#allocation7 + $0x68] ss:$16 sps:$4 sm:$0xff]  }
  0x5c   : > { %v1925_v63 = vld [vmem:[#allocation7 + $0x180] ss:$16 sps:$4 sm:$0xff]   ;;  %s2033_s26 = scalar_lea.vmem %s2360_s30, 1024  ;;  %s2039_s20 = scalar_lea.vmem %s2038_s11, 2048 }
  0x5d   : > { %1714 = vmatpush3.bf16.msra.mxu1 %v1832_v9  ;;  %v1931_v1 = vld [vmem:[#allocation7 + $0x160] ss:$16 sps:$4 sm:$0xff]   ;;  %p2034_p10 = scmp.ne.s32.totalorder %s2360_s30, %s2033_s26  ;;  %p2041_p6 = scmp.lt.s32.totalorder %s2039_s20, %s2033_s26 }
  0x5e   : > { %1715 = vmatprep.subr.bf16.mxu1 %v2158_v0  ;;  %744 = vmatpush1.bf16.msra.mxu0 %v1847_v21  ;;  %v1586_v2 = vld [vmem:[%s2436_s4] ss:$0 sm:$0xff]  ;;  %v1894_v21 = vld [vmem:[#allocation7 + $0x4c] ss:$16 sps:$4 sm:$0xff]  }
  0x5f   : > { %745 = vmatprep.subr.bf16.mxu0 %v1852_v22  ;;  %v1892_v22 = vld [vmem:[#allocation7 + $0x48] ss:$16 sps:$4 sm:$0xff]   ;;  %p2035_p11 = pnand %p2034_p10, %p2261_p4  ;;  %p2042_p7 = por %p2041_p6, %p2040_p3 }
  0x61   : > { %1716 = vmatpush3.bf16.msra.mxu1 %v1833_v10  ;;  %p2036_p13 = pneg %p2035_p11 }
  0x62   : > { %1717 = vmatprep.subr.bf16.mxu1 %v2158_v0  ;;  %746 = vmatpush1.bf16.msra.mxu0 %v1850_v23  ;;  %v1933_v0 = vld [vmem:[#allocation7 + $0x164] ss:$16 sps:$4 sm:$0xff]   ;;  %v1900_v23 = vld [vmem:[#allocation7 + $0x2c] ss:$16 sps:$4 sm:$0xff]  }
  0x63   : > { %747 = vmatprep.subr.bf16.mxu0 %v1855_v34  ;;  %v1928_v34 = vld [vmem:[#allocation7 + $0x188] ss:$16 sps:$4 sm:$0xff]   ;;  %p2043_p9 = pnand %p2042_p7, %p2036_p13 }
  0x65   : > { %1718 = vmatpush3.bf16.msra.mxu1 %v1834_v11  ;;  %v1862_v11 = vld [vmem:[#allocation7 + $0xe8] ss:$16 sps:$4 sm:$0xff]  }
  0x66   : > { %748 = vmatpush1.bf16.msra.mxu0 %v1853_v35  ;;  %1190 = vmatprep.subr.bf16.mxu1 %v1861_v40  ;;  %v1936_v35 = vld [vmem:[#allocation7 + $0x16c] ss:$16 sps:$4 sm:$0xff]   ;;  %v1940_v40 = vld [vmem:[#allocation7 + $0x148] ss:$16 sps:$4 sm:$0xff]  }
  0x67   : > { %749 = vmatprep.subr.bf16.mxu0 %v1858_v36  ;;  %v1934_v36 = vld [vmem:[#allocation7 + $0x168] ss:$16 sps:$4 sm:$0xff]  }
  0x6a   : > { %750 = vmatpush1.bf16.msra.mxu0 %v1856_v37  ;;  %v1939_v37 = vld [vmem:[#allocation7 + $0x144] ss:$16 sps:$4 sm:$0xff]  }
  0x6b   : > { %1233 = vmatprep.subr.bf16.mxu0 %v1864_v41  ;;  %v1945_v41 = vld [vmem:[#allocation7 + $0x124] ss:$16 sps:$4 sm:$0xff]  }
 0x10d   : > { %v502_v25 = vpop.f32.mrf.mxu0 }
 0x10e   : > { %v503_v27 = vadd.f32 %v1583_v24, %v502_v25  ;;  %v1906_v25 = vld [vmem:[#allocation7 + $0xc] ss:$16 sps:$4 sm:$0xff]  }
 0x10f   : > { %v1701_v26 = vpop.f32.mrf.mxu0 }
 0x110   : > { %v509_v31 = vmax.f32 %v503_v27, 0.0  ;;  %v1904_v26 = vld [vmem:[#allocation7 + $0x8] ss:$16 sps:$4 sm:$0xff]   ;;  %v1912_v27 = vld [vmem:[#allocation7 + $0x1ec] ss:$16 sps:$4 sm:$0xff]  }
 0x111   : > { %v505_v28 = vpop.f32.mrf.mxu0 }
 0x112   : > { %v506_v29 = vadd.f32 %v1583_v24, %v505_v28  ;;  %v1898_v24 = vld [vmem:[#allocation7 + $0x28] ss:$16 sps:$4 sm:$0xff]  }
 0x113   : > { %v1702_v30 = vpop.f32.mrf.mxu0  ;;  %v1910_v28 = vld [vmem:[#allocation7 + $0x1e8] ss:$16 sps:$4 sm:$0xff]  }
 0x114   : > { %v510_v32 = vmax.f32 %v506_v29, 0.0  ;;  %v1918_v29 = vld [vmem:[#allocation7 + $0x1cc] ss:$16 sps:$4 sm:$0xff]   ;;  %v1916_v30 = vld [vmem:[#allocation7 + $0x1c8] ss:$16 sps:$4 sm:$0xff]  }
 0x116   : > { %v511_v33 = vpack.c.bf16 %v510_v32, %v509_v31  ;;  %v1924_v31 = vld [vmem:[#allocation7 + $0x1ac] ss:$16 sps:$4 sm:$0xff]   ;;  %v1922_v32 = vld [vmem:[#allocation7 + $0x1a8] ss:$16 sps:$4 sm:$0xff]  }
 0x118   : > { %1720 = vmatmul.mubr.bf16.vlgmr.msra.gmra.mxu1 %v511_v33  ;;  %v1930_v33 = vld [vmem:[#allocation7 + $0x18c] ss:$16 sps:$4 sm:$0xff]  }
 0x119   : > { %1191 = vmatpush1.bf16.msra.mxu1 %v1859_v39  ;;  %v1937_v39 = vld [vmem:[#allocation7 + $0x140] ss:$16 sps:$4 sm:$0xff]  }
 0x11a   : > { %1192 = vmatprep.subr.bf16.mxu1 %v1867_v42  ;;  %v1948_v42 = vld [vmem:[#allocation7 + $0x12c] ss:$16 sps:$4 sm:$0xff]  }
 0x11d   : > { %1193 = vmatpush1.bf16.msra.mxu1 %v1865_v43  ;;  %v1943_v43 = vld [vmem:[#allocation7 + $0x120] ss:$16 sps:$4 sm:$0xff]  }
 0x11e   : > { %1194 = vmatprep.subr.bf16.mxu1 %v1873_v44  ;;  %v1946_v44 = vld [vmem:[#allocation7 + $0x128] ss:$16 sps:$4 sm:$0xff]  }
 0x121   : > { %1195 = vmatpush1.bf16.msra.mxu1 %v1871_v45  ;;  %v1951_v45 = vld [vmem:[#allocation7 + $0x104] ss:$16 sps:$4 sm:$0xff]  }
 0x122   : > { %1196 = vmatprep.subr.bf16.mxu1 %v1879_v46  ;;  %v1954_v46 = vld [vmem:[#allocation7 + $0x10c] ss:$16 sps:$4 sm:$0xff]  }
 0x125   : > { %1197 = vmatpush1.bf16.msra.mxu1 %v1877_v47  ;;  %v1949_v47 = vld [vmem:[#allocation7 + $0x100] ss:$16 sps:$4 sm:$0xff]  }
 0x126   : > { %1198 = vmatprep.subr.bf16.mxu1 %v1885_v48  ;;  %v1952_v48 = vld [vmem:[#allocation7 + $0x108] ss:$16 sps:$4 sm:$0xff]  }
 0x129   : > { %1199 = vmatpush1.bf16.msra.mxu1 %v1883_v49  ;;  %v645_v49 = vlaneseq }
 0x12a   : > { %1200 = vmatprep.subr.bf16.mxu1 %v1891_v50 }
 0x12b   : > { %v2343_v50 = vshrl.u32 %v645_v49, 7 }
 0x12d   : > { %1201 = vmatpush1.bf16.msra.mxu1 %v1889_v51  ;;  %v651_v51 = vsub.s32 1, %v2343_v50 }
 0x12e   : > { %1202 = vmatprep.subr.bf16.mxu1 %v1897_v52  ;;  %v647_v52 = vsub.s32 0, %v2343_v50 }
 0x131   : > { %1203 = vmatpush1.bf16.msra.mxu1 %v1895_v53  ;;  %v643_v53 = vld [vmem:[%s2438_s6] sm:$0x3] }
 0x132   : > { %1204 = vmatprep.subr.bf16.mxu1 %v1903_v54 }
 0x135   : > { %1205 = vmatpush1.bf16.msra.mxu1 %v1901_v55  ;;  %v652_v55 = vrot.slane %v643_v53, %v651_v51 }
 0x136   : > { %1206 = vmatprep.subr.bf16.mxu1 %v1909_v56  ;;  %v648_v56 = vrot.slane %v643_v53, %v647_v52 }
 0x139   : > { %1207 = vmatpush2.bf16.msra.mxu1 %v1907_v57 }
 0x13a   : > { %1208 = vmatprep.subr.bf16.mxu1 %v1915_v58 }
 0x13d   : > { %1209 = vmatpush2.bf16.msra.mxu1 %v1913_v59 }
 0x13e   : > { %1210 = vmatprep.subr.bf16.mxu1 %v1921_v60 }
 0x141   : > { %1211 = vmatpush2.bf16.msra.mxu1 %v1919_v61 }
 0x142   : > { %1212 = vmatprep.subr.bf16.mxu1 %v1927_v62 }
 0x145   : > { %1213 = vmatpush2.bf16.msra.mxu1 %v1925_v63 }
 0x146   : > { %1214 = vmatprep.subr.bf16.mxu1 %v1933_v0 }
 0x149   : > { %1215 = vmatpush2.bf16.msra.mxu1 %v1931_v1 }
 0x14a   : > { %1216 = vmatprep.subr.bf16.mxu1 %v1939_v37 }
 0x14d   : > { %1217 = vmatpush2.bf16.msra.mxu1 %v1937_v39 }
 0x14e   : > { %1218 = vmatprep.subr.bf16.mxu1 %v1945_v41 }
 0x151   : > { %1219 = vmatpush2.bf16.msra.mxu1 %v1943_v43 }
 0x152   : > { %1220 = vmatprep.subr.bf16.mxu1 %v1951_v45 }
 0x155   : > { %1221 = vmatpush2.bf16.msra.mxu1 %v1949_v47 }
 0x1d8   : > { %v617_v3 = vpop.f32.mrf.mxu1 }
 0x1d9   : > { %v618_v5 = vadd.f32 %v1586_v2, %v617_v3 }
 0x1da   : > { %v1721_v4 = vpop.f32.mrf.mxu1 }
 0x1db   : > { %v624_v9 = vmax.f32 %v618_v5, 0.0 }
 0x1dc   : > { %v620_v6 = vpop.f32.mrf.mxu1 }
 0x1dd   : > { %v621_v7 = vadd.f32 %v1586_v2, %v620_v6  ;;  %v860_v6 = vsub.s32 2, %v2343_v50 }
 0x1de   : > { %v1722_v8 = vpop.f32.mrf.mxu1 }
 0x1df   : > { %v625_v10 = vmax.f32 %v621_v7, 0.0  ;;  %v848_v7 = vld [vmem:[%s2440_s8] sm:$0xf]  ;;  %v864_v8 = vsub.s32 3, %v2343_v50 }
 0x1e1   : > { %v626_v12 = vpack.c.bf16 %v625_v10, %v624_v9  ;;  %v853_v9 = vrot.slane %v848_v7, %v647_v52  ;;  %v861_v10 = vrot.slane %v848_v7, %v860_v6 }
 0x1e3   : > { %768 = vmatmul.mubr.bf16.vlgmr.msra.gmra.mxu0 %v626_v12  ;;  %v865_v12 = vrot.slane %v848_v7, %v864_v8 }
 0x1e4   : > { %1234 = vmatpush1.bf16.msra.mxu0 %v1862_v11  ;;  %v857_v11 = vrot.slane %v848_v7, %v651_v51 }
 0x1e5   : > { %1235 = vmatprep.subr.bf16.mxu0 %v1870_v13 }
 0x1e8   : > { %1236 = vmatpush1.bf16.msra.mxu0 %v1868_v14 }
 0x1e9   : > { %1237 = vmatprep.subr.bf16.mxu0 %v1876_v15 }
 0x1ec   : > { %1238 = vmatpush1.bf16.msra.mxu0 %v1874_v16 }
 0x1ed   : > { %1239 = vmatprep.subr.bf16.mxu0 %v1882_v17 }
 0x1f0   : > { %1240 = vmatpush1.bf16.msra.mxu0 %v1880_v18 }
 0x1f1   : > { %1241 = vmatprep.subr.bf16.mxu0 %v1888_v19 }
 0x1f4   : > { %1242 = vmatpush1.bf16.msra.mxu0 %v1886_v20 }
 0x1f5   : > { %1243 = vmatprep.subr.bf16.mxu0 %v1894_v21 }
 0x1f8   : > { %1244 = vmatpush1.bf16.msra.mxu0 %v1892_v22 }
 0x1f9   : > { %1245 = vmatprep.subr.bf16.mxu0 %v1900_v23 }
 0x1fc   : > { %1246 = vmatpush1.bf16.msra.mxu0 %v1898_v24 }
 0x1fd   : > { %1247 = vmatprep.subr.bf16.mxu0 %v1906_v25 }
 0x200   : > { %1248 = vmatpush1.bf16.msra.mxu0 %v1904_v26 }
 0x201   : > { %1249 = vmatprep.subr.bf16.mxu0 %v1912_v27 }
 0x204   : > { %1250 = vmatpush2.bf16.msra.mxu0 %v1910_v28 }
 0x205   : > { %1251 = vmatprep.subr.bf16.mxu0 %v1918_v29 }
 0x208   : > { %1252 = vmatpush2.bf16.msra.mxu0 %v1916_v30 }
 0x209   : > { %1253 = vmatprep.subr.bf16.mxu0 %v1924_v31 }
 0x20c   : > { %1254 = vmatpush2.bf16.msra.mxu0 %v1922_v32 }
 0x20d   : > { %1255 = vmatprep.subr.bf16.mxu0 %v1930_v33 }
 0x210   : > { %1256 = vmatpush2.bf16.msra.mxu0 %v1928_v34 }
 0x211   : > { %1257 = vmatprep.subr.bf16.mxu0 %v1936_v35 }
 0x214   : > { %1258 = vmatpush2.bf16.msra.mxu0 %v1934_v36 }
 0x215   : > { %1259 = vmatprep.subr.bf16.mxu0 %v1942_v38 }
 0x218   : > { %1260 = vmatpush2.bf16.msra.mxu0 %v1940_v40 }
 0x219   : > { %1261 = vmatprep.subr.bf16.mxu0 %v1948_v42 }
 0x21c   : > { %1262 = vmatpush2.bf16.msra.mxu0 %v1946_v44 }
 0x21d   : > { %1263 = vmatprep.subr.bf16.mxu0 %v1954_v46 }
 0x220   : > { %1264 = vmatpush2.bf16.msra.mxu0 %v1952_v48 }
 0x2a3   : > { %v769_v54 = vpop.f32.mrf.mxu0 }
 0x2a4   : > { %v770_v61 = vadd.f32 %v769_v54, %v648_v56 }
 0x2a5   : > { %v771_v57 = vpop.f32.mrf.mxu0 }
 0x2a6   : > { %v772_v59 = vadd.f32 %v771_v57, %v652_v55  ;;  %v778_v3 = vmax.f32 %v770_v61, 0.0 }
 0x2a7   : > { %v773_v58 = vpop.f32.mrf.mxu0 }
 0x2a8   : > { %v774_v60 = vadd.f32 %v773_v58, %v648_v56  ;;  %v779_v1 = vmax.f32 %v772_v59, 0.0 }
 0x2a9   : > { %v775_v62 = vpop.f32.mrf.mxu0 }
 0x2aa   : > { %v776_v63 = vadd.f32 %v775_v62, %v652_v55  ;;  %v780_v0 = vmax.f32 %v774_v60, 0.0 }
 0x2ac   : > { %v781_v2 = vmax.f32 %v776_v63, 0.0  ;;  %v782_v5 = vpack.c.bf16 %v780_v0, %v778_v3 }
 0x2ae   : > { %v783_v4 = vpack.c.bf16 %v781_v2, %v779_v1 }
 0x2b0   : > { %1222 = vmatprep.mubr.bf16.mxu1 %v783_v4  ;;  %1265 = vmatprep.mubr.bf16.mxu0 %v783_v4 }
 0x2b1   : > { %1223 = vmatmul.mubr.bf16.vlgmr.msra.gmra.mxu1 %v782_v5  ;;  %1266 = vmatmul.mubr.bf16.vlgmr.msra.gmra.mxu0 %v782_v5 }
 0x371   : > { %v1224_v13 = vpop.f32.mrf.mxu1  ;;  %v1267_v14 = vpop.f32.mrf.mxu0 }
 0x372   : > { %v1225_v15 = vadd.f32 %v1224_v13, %v853_v9  ;;  %v1268_v16 = vadd.f32 %v1267_v14, %v861_v10 }
 0x373   : > { %v1226_v17 = vpop.f32.mrf.mxu1  ;;  %v1269_v18 = vpop.f32.mrf.mxu0 }
 0x374   : > { %1276 = vst [vmem:[%s432_s29] sm:$0xff] %v1225_v15  ;;  %1278 = vst [vmem:[%s432_s29 + $0x10] sm:$0xff] %v1268_v16  ;;  %v1227_v19 = vadd.f32 %v1226_v17, %v857_v11  ;;  %v1270_v20 = vadd.f32 %v1269_v18, %v865_v12 }
 0x375   : > { %v1228_v21 = vpop.f32.mrf.mxu1  ;;  %v1271_v22 = vpop.f32.mrf.mxu0 }
 0x376   : > { %1277 = vst [vmem:[%s432_s29 + $0x8] sm:$0xff] %v1227_v19  ;;  %1279 = vst [vmem:[%s432_s29 + $0x18] sm:$0xff] %v1270_v20  ;;  %v1229_v23 = vadd.f32 %v1228_v21, %v853_v9  ;;  %v1272_v24 = vadd.f32 %v1271_v22, %v861_v10 }
 0x377   : > { %v1230_v25 = vpop.f32.mrf.mxu1  ;;  %v1273_v26 = vpop.f32.mrf.mxu0 }
 0x378   : > { %1280 = vst [vmem:[%s432_s29 + $0x20] sm:$0xff] %v1229_v23  ;;  %v1284_v27 = vmax.f32 %v1225_v15, %v1229_v23  ;;  %1282 = vst [vmem:[%s432_s29 + $0x30] sm:$0xff] %v1272_v24  ;;  %v1298_v28 = vmax.f32 %v1268_v16, %v1272_v24  ;;  %v1231_v29 = vadd.f32 %v1230_v25, %v857_v11 }
 0x379   : > { %v1274_v30 = vadd.f32 %v1273_v26, %v865_v12 }
 0x37a   : > { %v1285_v31 = vrot.slane %v1284_v27, 4  ;;  %v1299_v32 = vrot.slane %v1298_v28, 4  ;;  %1281 = vst [vmem:[%s432_s29 + $0x28] sm:$0xff] %v1231_v29  ;;  %v1291_v33 = vmax.f32 %v1227_v19, %v1231_v29 }
 0x37b   : > { %1283 = vst [vmem:[%s432_s29 + $0x38] sm:$0xff] %v1274_v30  ;;  %v1305_v34 = vmax.f32 %v1270_v20, %v1274_v30 }
 0x37c   : > { %2046 = shalt.err (!%p2043_p9)
}
 0x37d   : > { %s2047_s19 = scalar_lea.hbm %s2365_s21, 1024  ;;  %s2051_s28 = scalar_lea.hbm %s2442_s10, 2048 }
 0x37e   : > { %p2048_p8 = scmp.ne.s32.totalorder %s2365_s21, %s2047_s19  ;;  %p2052_p2 = scmp.lt.s32.totalorder %s2365_s21, %s2442_s10 }
 0x37f   : > { %p2053_p5 = scmp.lt.s32.totalorder %s2051_s28, %s2047_s19 }
 0x380   : > { %p2049_p12 = pnand %p2048_p8, %p2261_p4 }
 0x381   : > { %p2054_p0 = por %p2053_p5, %p2052_p2 }
 0x382   : > { %p2050_p1 = pneg %p2049_p12 }
 0x384   : > { %p2055_p10 = pnand %p2054_p0, %p2050_p1 }
 0x386   : > { %2058 = shalt.err (!%p2055_p10)
}
 0x387   : > { %s2162_s26 = smov 512   ;;  %s2163_s11 = smov 32   ;;  %v1286_v35 = vmax.f32 %v1284_v27, %v1285_v31  ;;  %v1300_v36 = vmax.f32 %v1298_v28, %v1299_v32  ;;  %v1292_v37 = vrot.slane %v1291_v33, 4  ;;  %v1306_v38 = vrot.slane %v1305_v34, 4 }
 0x388   : > { %1736 = dma.vmem_to_hbm [thread:$0]  (%p2261_p4), %s2360_s30, 1024, %s2365_s21, %s1396_s12, %s2162_s26, %s2162_s26, %s2163_s11   ;;  %v2164_v39 = vmov 1966171168   ;;  %vm1347_vm3 = vcmp.lt.s32.totalorder %v645_v49, 512 }
 0x389   : > { %v1323_v40 = vunpack.c.l.s4 %v2164_v39  ;;  %v1287_v41 = vrot.slane %v1286_v35, 2  ;;  %v1301_v42 = vrot.slane %v1300_v36, 2  ;;  %v1293_v43 = vmax.f32 %v1291_v33, %v1292_v37  ;;  %s1579_s30 = sshll.u32 %s2352_s27, 2  ;;  %s1684_s21 = sshll.u32 %s2139_s16, 6 }
 0x38a   : > { %v1307_v44 = vmax.f32 %v1305_v34, %v1306_v38  ;;  %s425_s12 = scalar_lea.vmem [#allocation8], %s1579_s30  ;;  %s1408_s22 = scalar_lea.hbm %s2441_s9, %s1684_s21 }
 0x38b   : > { %v1288_v45 = vmax.f32 %v1286_v35, %v1287_v41  ;;  %v1302_v46 = vmax.f32 %v1300_v36, %v1301_v42  ;;  %v1294_v47 = vrot.slane %v1293_v43, 2  ;;  %v1324_v51 = vunpack.c.0.s8 %v1323_v40  ;;  %s1410_s20 = sshll.u32 %s425_s12, 4  ;;  %s1391_s28 = scalar_lea.sflag [#allocation4], %s2352_s27  ;;  %s1411_s20 = int_to_ptr.vmem [resolvable:$true] %s1410_s20 }
 0x38c   : > { %v1308_v48 = vrot.slane %v1307_v44, 2  ;;  %s2059_s24 = scalar_lea.vmem %s1411_s20, 64  ;;  %s2165_s17 = smov [#allocation8]  }
 0x38d   : > { %v1289_v52 = vrot.slane %v1288_v45, 1  ;;  %v1303_v53 = vrot.slane %v1302_v46, 1  ;;  %v1295_v54 = vmax.f32 %v1293_v43, %v1294_v47  ;;  %v1327_v58 = vsub.s32 %v1324_v51, %v2343_v50  ;;  %p2060_p11 = scmp.ne.s32.totalorder %s1411_s20, %s2059_s24  ;;  %s2063_s16 = sshll.u32 %s2165_s17, 4  ;;  %s2064_s16 = int_to_ptr.vmem [resolvable:$false] %s2063_s16 }
 0x38e   : > { %v1309_v55 = vmax.f32 %v1307_v44, %v1308_v48  ;;  %s2065_s26 = scalar_lea.vmem %s2064_s16, 128  ;;  %p2066_p6 = scmp.lt.s32.totalorder %s1411_s20, %s2064_s16 }
 0x38f   : > { %v1296_v56 = vrot.slane %v1295_v54, 1  ;;  %v1290_v59 = vmax.f32 %v1288_v45, %v1289_v52  ;;  %v1304_v60 = vmax.f32 %v1302_v46, %v1303_v53  ;;  %p2061_p13 = pnand %p2060_p11, %p2261_p4  ;;  %p2067_p7 = scmp.lt.s32.totalorder %s2065_s26, %s2059_s24 }
 0x390   : > { %v1310_v57 = vrot.slane %v1309_v55, 1 }
 0x391   : > { %v1297_v61 = vmax.f32 %v1295_v54, %v1296_v56  ;;  %p2062_p3 = pneg %p2061_p13  ;;  %p2068_p9 = por %p2067_p7, %p2066_p6 }
 0x392   : > { %v1311_v62 = vmax.f32 %v1309_v55, %v1310_v57 }
 0x393   : > { %v1320_v63 = vcombine.low %v1290_v59, %v1297_v61  ;;  %p2069_p8 = pnand %p2068_p9, %p2062_p3 }
 0x394   : > { %v1321_v0 = vcombine.low %v1304_v60, %v1311_v62 }
 0x395   : > { %v1328_v1 = vrot.slane %v1320_v63, %v1327_v58 }
 0x396   : > { %v1335_v2 = vrot.slane %v1321_v0, %v1327_v58 }
 0x398   : > { %v1336_v3 = vcombine.low %v1328_v1, %v1335_v2 }
 0x39a   : > { %v1343_v4 = vrot.slane %v1336_v3, %v1327_v58 }
 0x39c   : > { %1349 = vst.msk [vmem:[%s425_s12] sm:$0xf] %vm1347_vm3, %v1343_v4 }
 0x39d   : > { %2072 = shalt.err (!%p2069_p8)
}
 0x39e   : > { %s2073_s11 = scalar_lea.hbm %s1408_s22, 64  ;;  %s2077_s21 = scalar_lea.hbm %s2441_s9, 128 }
 0x39f   : > { %p2074_p12 = scmp.ne.s32.totalorder %s1408_s22, %s2073_s11  ;;  %p2078_p5 = scmp.lt.s32.totalorder %s1408_s22, %s2441_s9 }
 0x3a0   : > { %p2079_p0 = scmp.lt.s32.totalorder %s2077_s21, %s2073_s11 }
 0x3a1   : > { %p2075_p1 = pnand %p2074_p12, %p2261_p4 }
 0x3a2   : > { %p2080_p10 = por %p2079_p0, %p2078_p5 }
 0x3a3   : > { %p2076_p2 = pneg %p2075_p1 }
 0x3a5   : > { %p2081_p11 = pnand %p2080_p10, %p2076_p2 }
 0x3a7   : > { %2084 = shalt.err (!%p2081_p11)
}
 0x3a8   : > { %1735 = dma.vmem_to_hbm [thread:$0]  (%p2261_p4), %s1411_s20, 64, %s1408_s22, %s1391_s28  }
 0x3a9 PF: > { %p1762_p13 = scmp.ge.s32.totalorder %s2147_s18, 2  ;;  %s1441_s29 = sand.u32 1, %s2127_s13  }
 0x3aa   : > { %p2453_p3 = scmp.ne.s32.totalorder %s2448_s25, 0  ;;  %s1442_s24 = scalar_lea.sflag [#allocation4], %s1441_s29 }
 0x3ac   : > { %p1750_p6 = pnand %p1762_p13, %p2453_p3 }
 0x3ae   : > { %p1751_p7 = pneg %p1750_p6 }
 0x3b0   : > { %2118 = dma.done.wait (%p1751_p7), %s1442_s24, 64  }
 0x3b1   : > { %2120 = vsyncadd (%p1751_p7), %s1442_s24, 4294967232  ;;  %s1451_s17 = scalar_lea.sflag [#allocation10], %s1441_s29 }
 0x3b2   : > { %2122 = dma.done.wait (%p1751_p7), %s1451_s17, 1024  }
 0x3b3   : > { %2124 = vsyncadd (%p1751_p7), %s1451_s17, 4294966272  ;;  %s29_s18 = sadd.s32 1, %s2147_s18   ;;  %s2454_s23 = sld [smem:[#allocation17_spill]] }
 0x3b4   : > { %p26_p9 = scmp.ge.s32.totalorder %s29_s18, 4   ;;  %s2455_s16 = sld [smem:[#allocation15_spill]] }
 0x3b5   : > { %s2456_s17 = sld [smem:[#allocation16_spill]]  ;;  %s2457_s13 = smov %s2131_s14 }
 0x3b6   : > { %s2458_s14 = smov %s2135_s15  ;;  %28 = sbr.rel (!%p26_p9) target bundleno = 8 (0x8), region = 129 }
 0x3b9   : > { %s2459_s15 = smov %s2454_s23 }
 0x3bb   :  { %1456 = vsyncpa [#allocation3], 1 }
 0x3bc   :  { %1458 = vsyncpa [#allocation3 + $0x1], 1 }
 0x3bd   :  { %1459 = vsyncpa [#allocation6], 1 }
 0x3be   :  { %1460 = vsyncpa [#allocation4], 1 }
 0x3bf   :  { %1462 = vsyncpa [#allocation4 + $0x1], 1 }
 0x3c0   :  { %1463 = vsyncpa [#allocation10], 1 }
 0x3c1   :  { %1465 = vsyncpa [#allocation10 + $0x1], 1 }

</bundles_post_ra>
